<compile_context>
chip_gen: v7x
topology: tpu7x:2x2x1
jax: 0.10.0
libtpu: 0.0.40
codegen_flags: <defaults>
</compile_context>

<pallas_src>
import jax
import jax.numpy as jnp
from jax.experimental import pallas as pl
from jax.experimental.pallas import tpu as pltpu

EPS = 1e-5
_MAX_LANE_TILE = 2048
_MAX_BLOCK_BYTES = 2 * 1024 * 1024  # per-buffer block budget (f32)


# ---------------------------------------------------------------------------
# Kernels
# ---------------------------------------------------------------------------
def _stats_kernel(x_ref, sum_ref, sumsq_ref):
    """Accumulate per-channel sum and sum-of-squares over all grid steps.

    x_ref:     (tn, C, tl)  tile of the (N, C, H*W) slab
    sum_ref:   (C, 1)       resident accumulator (same block every step)
    sumsq_ref: (C, 1)       resident accumulator
    """
    @pl.when((pl.program_id(0) == 0) & (pl.program_id(1) == 0))
    def _():
        sum_ref[...] = jnp.zeros_like(sum_ref)
        sumsq_ref[...] = jnp.zeros_like(sumsq_ref)

    x = x_ref[...].astype(jnp.float32)                       # (tn, C, tl)
    s = jnp.sum(x, axis=0)                                   # (C, tl)  VPU
    s2 = jnp.sum(x * x, axis=0)                              # (C, tl)  VPU
    sum_ref[...] += jnp.sum(s, axis=1, keepdims=True)        # (C, 1)   XLU
    sumsq_ref[...] += jnp.sum(s2, axis=1, keepdims=True)     # (C, 1)   XLU


def _apply_kernel(x_ref, a_ref, b_ref, o_ref):
    """out = a[c] * x + b[c]   (normalize + graph-combined affine, folded).

    x_ref: (tn, C, tl);  a_ref, b_ref: (1, C, 1) resident;  o_ref: (tn, C, tl)
    """
    x = x_ref[...].astype(jnp.float32)
    o_ref[...] = (x * a_ref[...] + b_ref[...]).astype(o_ref.dtype)


# ---------------------------------------------------------------------------
# Tile selection (static shapes under jit)
# ---------------------------------------------------------------------------
def _lane_tile(total):
    """Largest power-of-two multiple of 128 dividing `total` (<= cap), else full."""
    t = _MAX_LANE_TILE
    while t >= 128:
        if t <= total and total % t == 0:
            return t
        t //= 2
    return total  # full dim is always a legal block extent


def _row_tile(n, c, tl):
    budget = max(1, _MAX_BLOCK_BYTES // (c * tl * 4))
    for t in range(min(n, budget), 0, -1):
        if n % t == 0:
            return t
    return 1


# ---------------------------------------------------------------------------
# Forward
# ---------------------------------------------------------------------------
@jax.jit
def graphbn_forward(x_nchw, d, edges, scale, bias):
    """x_nchw: (N, C, H, W).  d: scalar domain index.
    edges: (D, D, 1), scale/bias: (D, C)."""
    N, C, H, W = x_nchw.shape
    L = H * W
    x3 = x_nchw.reshape(N, C, L)          # contiguous view -> free reshape

    tl = _lane_tile(L)
    tn = _row_tile(N, C, tl)
    grid = (N // tn, L // tl)

    x_spec = pl.BlockSpec((tn, C, tl), lambda i, j: (i, 0, j))
    stat_spec = pl.BlockSpec((C, 1), lambda i, j: (0, 0))

    # ---- pass 1: per-channel batch statistics (global accumulation) ----
    s, ss = pl.pallas_call(
        _stats_kernel,
        out_shape=(jax.ShapeDtypeStruct((C, 1), jnp.float32),
                   jax.ShapeDtypeStruct((C, 1), jnp.float32)),
        grid=grid,
        in_specs=[x_spec],
        out_specs=(stat_spec, stat_spec),
        compiler_params=pltpu.CompilerParams(
            dimension_semantics=("arbitrary", "arbitrary")),
    )(x3)

    # ---- tiny (C,)-sized math: stats -> (a, b), plus combine_sb(d) ----
    count = jnp.float32(N * L)
    mean = s / count                                          # (C, 1)
    var = jnp.maximum(ss / count - mean * mean, 0.0)          # biased, clamped
    inv_std = jax.lax.rsqrt(var + EPS)                        # (C, 1)

    edges_d = jax.lax.dynamic_index_in_dim(edges, d, axis=0,
                                           keepdims=False)    # (D, 1)
    comb_scale = jnp.sum(edges_d * scale, axis=0)[:, None]    # (C, 1)
    comb_bias = jnp.sum(edges_d * bias, axis=0)[:, None]      # (C, 1)

    a = comb_scale * inv_std                                  # (C, 1)
    b = comb_bias - a * mean                                  # (C, 1)
    a3 = a.reshape(1, C, 1)
    b3 = b.reshape(1, C, 1)

    # ---- pass 2: out = a * x + b (bandwidth-bound, fully parallel) ----
    out3 = pl.pallas_call(
        _apply_kernel,
        out_shape=jax.ShapeDtypeStruct((N, C, L), x_nchw.dtype),
        grid=grid,
        in_specs=[x_spec,
                  pl.BlockSpec((1, C, 1), lambda i, j: (0, 0, 0)),
                  pl.BlockSpec((1, C, 1), lambda i, j: (0, 0, 0))],
        out_specs=x_spec,
        compiler_params=pltpu.CompilerParams(
            dimension_semantics=("parallel", "parallel")),
    )(x3, a3, b3)

    return out3.reshape(N, C, H, W)


# ---------------------------------------------------------------------------
# Pure-JAX reference (PyTorch forward, training-mode BN)
# ---------------------------------------------------------------------------
def graphbn_reference(x_nchw, d, edges, scale, bias):
    mean = jnp.mean(x_nchw, axis=(0, 2, 3), keepdims=True)
    var = jnp.mean((x_nchw - mean) ** 2, axis=(0, 2, 3), keepdims=True)
    x_hat = (x_nchw - mean) / jnp.sqrt(var + EPS)
    e = edges[d]                                              # (D, 1)
    comb_scale = jnp.sum(e * scale, axis=0)                   # (C,)
    comb_bias = jnp.sum(e * bias, axis=0)                     # (C,)
    return (comb_scale[None, :, None, None] * x_hat
            + comb_bias[None, :, None, None])


# TODO(synk): BatchNorm running-mean/var (momentum) buffer updates are a
# training-time side effect and are not modeled; the forward output does not
# depend on them in training mode.

if __name__ == "__main__":
    domains = 30
    features = 4

    key = jax.random.PRNGKey(0)
    kx1, kx2, ks, kb, ke = jax.random.split(key, 5)

    # Deterministic parameter init (shapes match the module exactly); the
    # module's defaults (scale=1, bias=0, edges=0) are perturbed so the graph
    # combination is numerically non-trivial.
    scale = jnp.ones((domains, features), jnp.float32) \
        + 0.1 * jax.random.normal(ks, (domains, features), jnp.float32)
    bias = 0.1 * jax.random.normal(kb, (domains, features), jnp.float32)
    edges = (jnp.eye(domains, dtype=jnp.float32)
             + 0.05 * jax.random.uniform(ke, (domains, domains),
                                         dtype=jnp.float32))[:, :, None]
    d = 3  # domain index

    test_shapes = [
        (kx1, (2, features, 16, 16)),   # single-block grid
        (kx2, (2, features, 64, 64)),   # exercises lane tiling + accumulation
    ]
    for kx, shape in test_shapes:
        x = jax.random.normal(kx, shape, dtype=jnp.float32)
        out = jax.block_until_ready(graphbn_forward(x, d, edges, scale, bias))
        ref = graphbn_reference(x, d, edges, scale, bias)
        assert out.shape == shape
        assert jnp.allclose(out, ref, rtol=1e-5, atol=1e-5), \
            f"mismatch vs reference at shape {shape}"

    print("KERNEL_OK")
</pallas_src>

<mosaic_0001>
module attributes {stable_mosaic.version = 11 : i64} {
  func.func @_apply_kernel(%arg0: i32, %arg1: i32, %arg2: memref<2x4x256xf32, #tpu.memory_space<vmem>>, %arg3: memref<1x4x1xf32, #tpu.memory_space<vmem>>, %arg4: memref<1x4x1xf32, #tpu.memory_space<vmem>>, %arg5: memref<2x4x256xf32, #tpu.memory_space<vmem>>) attributes {dimension_semantics = [#tpu.dimension_semantics<parallel>, #tpu.dimension_semantics<parallel>], iteration_bounds = array<i64: 1, 1>, scalar_prefetch = 0 : i64, scratch_operands = 0 : i64, tpu.core_type = #tpu.core_type<tc>, window_params = [{transform_indices = @transform_0, window_bounds = array<i64: 2, 4, 256>}, {pipeline_mode = #tpu.pipeline_mode<synchronous>, transform_indices = @transform_1, window_bounds = array<i64: 1, 4, 1>}, {pipeline_mode = #tpu.pipeline_mode<synchronous>, transform_indices = @transform_2, window_bounds = array<i64: 1, 4, 1>}, {transform_indices = @transform_3, window_bounds = array<i64: 2, 4, 256>}]} {
    %c0 = arith.constant 0 : index
    %c0_0 = arith.constant 0 : index
    %c0_1 = arith.constant 0 : index
    %0 = vector.load %arg2[%c0, %c0_0, %c0_1] : memref<2x4x256xf32, #tpu.memory_space<vmem>>, vector<2x4x256xf32>
    %c0_2 = arith.constant 0 : index
    %c0_3 = arith.constant 0 : index
    %c0_4 = arith.constant 0 : index
    %1 = vector.load %arg3[%c0_2, %c0_3, %c0_4] : memref<1x4x1xf32, #tpu.memory_space<vmem>>, vector<1x4x1xf32>
    %2 = vector.broadcast %1 : vector<1x4x1xf32> to vector<2x4x256xf32>
    %3 = arith.mulf %0, %2 : vector<2x4x256xf32>
    %c0_5 = arith.constant 0 : index
    %c0_6 = arith.constant 0 : index
    %c0_7 = arith.constant 0 : index
    %4 = vector.load %arg4[%c0_5, %c0_6, %c0_7] : memref<1x4x1xf32, #tpu.memory_space<vmem>>, vector<1x4x1xf32>
    %5 = vector.broadcast %4 : vector<1x4x1xf32> to vector<2x4x256xf32>
    %6 = arith.addf %3, %5 : vector<2x4x256xf32>
    %c0_8 = arith.constant 0 : index
    %c0_9 = arith.constant 0 : index
    %c0_10 = arith.constant 0 : index
    %7 = vector.load %arg5[%c0_8, %c0_9, %c0_10] : memref<2x4x256xf32, #tpu.memory_space<vmem>>, vector<2x4x256xf32>
    tpu.vector_store %arg5[%c0_8, %c0_9, %c0_10], %6 {strides = array<i32>} : memref<2x4x256xf32, #tpu.memory_space<vmem>>, vector<2x4x256xf32>,
    return
  }
  func.func @transform_0(%arg0: i32, %arg1: i32) -> (i32, i32, i32) {
    %c0_i32 = arith.constant 0 : i32
    %c0_i32_0 = arith.constant 0 : i32
    return %arg0, %c0_i32, %arg1 : i32, i32, i32
  }
  func.func @transform_1(%arg0: i32, %arg1: i32) -> (i32, i32, i32) {
    %c0_i32 = arith.constant 0 : i32
    %c0_i32_0 = arith.constant 0 : i32
    %c0_i32_1 = arith.constant 0 : i32
    %c0_i32_2 = arith.constant 0 : i32
    return %c0_i32, %c0_i32_0, %c0_i32_1 : i32, i32, i32
  }
  func.func @transform_2(%arg0: i32, %arg1: i32) -> (i32, i32, i32) {
    %c0_i32 = arith.constant 0 : i32
    %c0_i32_0 = arith.constant 0 : i32
    %c0_i32_1 = arith.constant 0 : i32
    %c0_i32_2 = arith.constant 0 : i32
    return %c0_i32, %c0_i32_0, %c0_i32_1 : i32, i32, i32
  }
  func.func @transform_3(%arg0: i32, %arg1: i32) -> (i32, i32, i32) {
    %c0_i32 = arith.constant 0 : i32
    %c0_i32_0 = arith.constant 0 : i32
    return %arg0, %c0_i32, %arg1 : i32, i32, i32
  }
}

module attributes {stable_mosaic.version = 11 : i64} {
  func.func @_stats_kernel(%arg0: i32, %arg1: i32, %arg2: memref<2x4x256xf32, #tpu.memory_space<vmem>>, %arg3: memref<4x1xf32, #tpu.memory_space<vmem>>, %arg4: memref<4x1xf32, #tpu.memory_space<vmem>>) attributes {dimension_semantics = [#tpu.dimension_semantics<arbitrary>, #tpu.dimension_semantics<arbitrary>], iteration_bounds = array<i64: 1, 1>, scalar_prefetch = 0 : i64, scratch_operands = 0 : i64, tpu.core_type = #tpu.core_type<tc>, window_params = [{transform_indices = @transform_0, window_bounds = array<i64: 2, 4, 256>}, {pipeline_mode = #tpu.pipeline_mode<synchronous>, transform_indices = @transform_1, window_bounds = array<i64: 4, 1>}, {pipeline_mode = #tpu.pipeline_mode<synchronous>, transform_indices = @transform_2, window_bounds = array<i64: 4, 1>}]} {
    %c0_i32 = arith.constant 0 : i32
    %0 = arith.cmpi eq, %arg0, %c0_i32 : i32
    %c0_i32_0 = arith.constant 0 : i32
    %1 = arith.cmpi eq, %arg1, %c0_i32_0 : i32
    %2 = arith.andi %0, %1 : i1
    %3 = arith.extui %2 : i1 to i32
    %c0_i32_1 = arith.constant 0 : i32
    %4 = arith.cmpi ne, %3, %c0_i32_1 : i32
    scf.if %4 {
      %cst_15 = arith.constant 0.000000e+00 : f32
      %19 = vector.broadcast %cst_15 : f32 to vector<4x1xf32>
      %c0_16 = arith.constant 0 : index
      %c0_17 = arith.constant 0 : index
      %20 = vector.load %arg3[%c0_16, %c0_17] : memref<4x1xf32, #tpu.memory_space<vmem>>, vector<4x1xf32>
      tpu.vector_store %arg3[%c0_16, %c0_17], %19 {strides = array<i32>} : memref<4x1xf32, #tpu.memory_space<vmem>>, vector<4x1xf32>,
      %cst_18 = arith.constant 0.000000e+00 : f32
      %21 = vector.broadcast %cst_18 : f32 to vector<4x1xf32>
      %c0_19 = arith.constant 0 : index
      %c0_20 = arith.constant 0 : index
      %22 = vector.load %arg4[%c0_19, %c0_20] : memref<4x1xf32, #tpu.memory_space<vmem>>, vector<4x1xf32>
      tpu.vector_store %arg4[%c0_19, %c0_20], %21 {strides = array<i32>} : memref<4x1xf32, #tpu.memory_space<vmem>>, vector<4x1xf32>,
    } else {
    }
    %c0 = arith.constant 0 : index
    %c0_2 = arith.constant 0 : index
    %c0_3 = arith.constant 0 : index
    %5 = vector.load %arg2[%c0, %c0_2, %c0_3] : memref<2x4x256xf32, #tpu.memory_space<vmem>>, vector<2x4x256xf32>
    %cst = arith.constant dense<0.000000e+00> : vector<4x256xf32>
    %6 = vector.multi_reduction <add>, %5, %cst [0] : vector<2x4x256xf32> to vector<4x256xf32>
    %7 = arith.mulf %5, %5 : vector<2x4x256xf32>
    %cst_4 = arith.constant dense<0.000000e+00> : vector<4x256xf32>
    %8 = vector.multi_reduction <add>, %7, %cst_4 [0] : vector<2x4x256xf32> to vector<4x256xf32>
    %c0_5 = arith.constant 0 : index
    %c0_6 = arith.constant 0 : index
    %9 = vector.load %arg3[%c0_5, %c0_6] : memref<4x1xf32, #tpu.memory_space<vmem>>, vector<4x1xf32>
    %cst_7 = arith.constant dense<0.000000e+00> : vector<4xf32>
    %10 = vector.multi_reduction <add>, %6, %cst_7 [1] : vector<4x256xf32> to vector<4xf32>
    %11 = vector.shape_cast %10 : vector<4xf32> to vector<4x1xf32>
    %12 = arith.addf %9, %11 : vector<4x1xf32>
    %c0_8 = arith.constant 0 : index
    %c0_9 = arith.constant 0 : index
    %13 = vector.load %arg3[%c0_8, %c0_9] : memref<4x1xf32, #tpu.memory_space<vmem>>, vector<4x1xf32>
    tpu.vector_store %arg3[%c0_8, %c0_9], %12 {strides = array<i32>} : memref<4x1xf32, #tpu.memory_space<vmem>>, vector<4x1xf32>,
    %c0_10 = arith.constant 0 : index
    %c0_11 = arith.constant 0 : index
    %14 = vector.load %arg4[%c0_10, %c0_11] : memref<4x1xf32, #tpu.memory_space<vmem>>, vector<4x1xf32>
    %cst_12 = arith.constant dense<0.000000e+00> : vector<4xf32>
    %15 = vector.multi_reduction <add>, %8, %cst_12 [1] : vector<4x256xf32> to vector<4xf32>
    %16 = vector.shape_cast %15 : vector<4xf32> to vector<4x1xf32>
    %17 = arith.addf %14, %16 : vector<4x1xf32>
    %c0_13 = arith.constant 0 : index
    %c0_14 = arith.constant 0 : index
    %18 = vector.load %arg4[%c0_13, %c0_14] : memref<4x1xf32, #tpu.memory_space<vmem>>, vector<4x1xf32>
    tpu.vector_store %arg4[%c0_13, %c0_14], %17 {strides = array<i32>} : memref<4x1xf32, #tpu.memory_space<vmem>>, vector<4x1xf32>,
    return
  }
  func.func @transform_0(%arg0: i32, %arg1: i32) -> (i32, i32, i32) {
    %c0_i32 = arith.constant 0 : i32
    %c0_i32_0 = arith.constant 0 : i32
    return %arg0, %c0_i32, %arg1 : i32, i32, i32
  }
  func.func @transform_1(%arg0: i32, %arg1: i32) -> (i32, i32) {
    %c0_i32 = arith.constant 0 : i32
    %c0_i32_0 = arith.constant 0 : i32
    %c0_i32_1 = arith.constant 0 : i32
    return %c0_i32, %c0_i32_0 : i32, i32
  }
  func.func @transform_2(%arg0: i32, %arg1: i32) -> (i32, i32) {
    %c0_i32 = arith.constant 0 : i32
    %c0_i32_0 = arith.constant 0 : i32
    %c0_i32_1 = arith.constant 0 : i32
    return %c0_i32, %c0_i32_0 : i32, i32
  }
}

</mosaic_0001>

<bundles_post_ra>
// kernel: graphbn_forward.2
= control target key start
LH: loop header
LB: loop body
LE: loop exit
PB: predicated region body
PF: predicated region fallthrough
CT: control target
= control target key end

     0   :  { %vm27_vm0 = vcmask 1043456   ;;  %vm16_vm1 = vcmask 3072   ;;  %v76_v2 = vmov 0.0   ;;  %s132_s0 = inlined_call_operand.vmem [shape: f32[2,4,256], index: 0, kind: input, shape index: {}]   ;;  %s133_s1 = inlined_call_operand.vmem [shape: f32[4,1], index: 1, kind: output, shape index: {0}]   ;;  %s134_s2 = inlined_call_operand.vmem [shape: f32[4,1], index: 2, kind: output, shape index: {1}]  }
   0x1   :  { %v19_v0 = vld [vmem:[%s132_s0] sm:$0xff]  ;;  %v20_v1 = vld [vmem:[%s132_s0 + $0x8] sm:$0xff]  ;;  %17 = vst.msk [vmem:[%s133_s1] sm:$0xf] %vm16_vm1, %v76_v2  ;;  %18 = vst.msk [vmem:[%s134_s2] sm:$0xf] %vm16_vm1, %v76_v2 }
   0x2   :  { %v23_v3 = vcombine.high %v19_v0, %v19_v0  ;;  %v24_v4 = vcombine.high %v20_v1, %v20_v1  ;;  %v28_v5 = vsel %vm27_vm0, %v19_v0, 0.0  ;;  %v29_v6 = vsel %vm27_vm0, %v20_v1, 0.0 }
   0x3   :  { %v30_v7 = vadd.f32 %v29_v6, %v28_v5  ;;  %v34_v8 = vmul.f32 %v19_v0, %v19_v0  ;;  %v35_v9 = vmul.f32 %v20_v1, %v20_v1 }
   0x4   :  { %v31_v10 = vsel %vm27_vm0, %v23_v3, 0.0  ;;  %v32_v11 = vsel %vm27_vm0, %v24_v4, 0.0 }
   0x5   :  { %v33_v12 = vadd.f32 %v32_v11, %v31_v10  ;;  %v49_v13 = vsel %vm27_vm0, %v30_v7, 0.0  ;;  %v38_v14 = vcombine.high %v34_v8, %v34_v8  ;;  %v39_v15 = vcombine.high %v35_v9, %v35_v9 }
   0x6   :  { %v42_v16 = vsel %vm27_vm0, %v34_v8, 0.0  ;;  %v43_v17 = vsel %vm27_vm0, %v35_v9, 0.0 }
   0x7   :  { %v50_v18 = vsel %vm27_vm0, %v33_v12, 0.0  ;;  %v44_v19 = vadd.f32 %v43_v17, %v42_v16  ;;  %v45_v20 = vsel %vm27_vm0, %v38_v14, 0.0  ;;  %v46_v21 = vsel %vm27_vm0, %v39_v15, 0.0 }
   0x8   :  { %v51_v22 = vadd.f32 %v50_v18, %v49_v13  ;;  %v47_v23 = vadd.f32 %v46_v21, %v45_v20  ;;  %v48_v27 = vld [vmem:[%s133_s1] sm:$0xf] }
   0x9   :  { %v58_v24 = vsel %vm27_vm0, %v44_v19, 0.0  ;;  %v57_v30 = vld [vmem:[%s134_s2] sm:$0xf] }
   0xa   :  { %52 = vadd.xlane.f32.xlu0 %v51_v22  ;;  %v59_v25 = vsel %vm27_vm0, %v47_v23, 0.0 }
   0xb   :  { %v60_v26 = vadd.f32 %v59_v25, %v58_v24 }
   0xe   :  { %61 = vadd.xlane.f32.xlu0 %v60_v26 }
  0x97   :  { %v53_v28 = vpop.xlane.xlu0 %52 }
  0x98   :  { %v54_v29 = vadd.f32 %v53_v28, %v48_v27 }
  0x9a   :  { %56 = vst.msk [vmem:[%s133_s1] sm:$0xf] %vm16_vm1, %v54_v29 }
  0x9b   :  { %v62_v31 = vpop.xlane.xlu0 %61 }
  0x9c   :  { %v63_v32 = vadd.f32 %v62_v31, %v57_v30 }
  0x9e   :  { %64 = vst.msk [vmem:[%s134_s2] sm:$0xf] %vm16_vm1, %v63_v32 }

// kernel: graphbn_forward.3
= control target key start
LH: loop header
LB: loop body
LE: loop exit
PB: predicated region body
PF: predicated region fallthrough
CT: control target
= control target key end

     0   :  { %v55_v0 = vmov 0   ;;  %v56_v3 = vmov 839922192   ;;  %v24_v5 = vlaneseq  ;;  %s95_s1 = inlined_call_operand.vmem [shape: f32[1,4,1], index: 1, kind: input, shape index: {}]   ;;  %s96_s2 = inlined_call_operand.vmem [shape: f32[1,4,1], index: 2, kind: input, shape index: {}]   ;;  %s97_s0 = inlined_call_operand.vmem [shape: f32[2,4,256], index: 0, kind: input, shape index: {}]   ;;  %s98_s3 = inlined_call_operand.vmem [shape: f32[2,4,256], index: 3, kind: output, shape index: {}]  }
   0x1   :  { %54 = vset.pattern.permute.xlu0 %v55_v0  ;;  %v16_v1 = vld [vmem:[%s95_s1] sm:$0xf]  ;;  %v22_v4 = vunpack.c.l.s4 %v56_v3  ;;  %v15_v12 = vld [vmem:[%s97_s0 + $0x8] sm:$0xff] }
   0x2   :  { %19 = vperm.xlu0 %54, %v16_v1   ;;  %v31_v2 = vld [vmem:[%s96_s2] sm:$0xf]  ;;  %v25_v7 = vshrl.u32 %v24_v5, 7 }
   0x3   :  { %v23_v6 = vunpack.c.0.s8 %v22_v4  ;;  %v14_v11 = vld [vmem:[%s97_s0] sm:$0xff] }
   0x5   :  { %v26_v8 = vsub.s32 %v23_v6, %v25_v7 }
   0x6   :  { %34 = vperm.xlu0 %54, %v31_v2  }
  0x81   :  { %v20_v9 = vpop.permute.xlu0 %19 }
  0x82   :  { %v27_v10 = vrot.slane %v20_v9, %v26_v8 }
  0x84   :  { %v29_v14 = vmul.f32 %v27_v10, %v14_v11  ;;  %v30_v15 = vmul.f32 %v27_v10, %v15_v12 }
  0x85   :  { %v35_v13 = vpop.permute.xlu0 %34 }
  0x86   :  { %v42_v16 = vrot.slane %v35_v13, %v26_v8 }
  0x88   :  { %v44_v17 = vadd.f32 %v42_v16, %v29_v14  ;;  %v45_v18 = vadd.f32 %v42_v16, %v30_v15 }
  0x8a   :  { %46 = vst [vmem:[%s98_s3] sm:$0xff] %v44_v17  ;;  %47 = vst [vmem:[%s98_s3 + $0x8] sm:$0xff] %v45_v18 }

</bundles_post_ra>
